<compile_context>
chip_gen: v6e
topology: v6e:2x2x1
jax: 0.10.0
libtpu: 0.0.40
codegen_flags: <defaults>
</compile_context>

<pallas_src>
import math

import jax
import jax.numpy as jnp
from jax.experimental import pallas as pl
from jax.experimental.pallas import tpu as pltpu


def _mhdpa_kernel(x_ref, ctx_ref, wq_ref, wk_ref, wv_ref, out_ref,
                  k_scratch, v_scratch):
    """Grid = (batch, query_tile).

    x_ref   : (1, tn, C_in)      query tokens (channels-last)
    ctx_ref : (1, M,  C_ctx)     context tokens (channels-last)
    wq_ref  : (H, C_in,  d_qk)   head-major query proj (scale pre-folded)
    wk_ref  : (H, C_ctx, d_qk)   head-major key proj
    wv_ref  : (H, C_ctx, d_v)    head-major value proj
    out_ref : (1, H, tn, d_v)    per-head attention output
    k_scratch / v_scratch : VMEM (H, M, d_qk) / (H, M, d_v), persist across
                            query tiles of one batch element.
    """
    dt = x_ref.dtype
    num_heads = wq_ref.shape[0]

    # Project K/V once per batch element. The query-tile axis is the inner,
    # "arbitrary" (sequential) grid axis, so tile 0 always runs first per batch.
    @pl.when(pl.program_id(1) == 0)
    def _():
        ctx = ctx_ref[0]                                            # (M, C_ctx)
        ctx_b = jnp.broadcast_to(ctx[None], (num_heads,) + ctx.shape)
        k_scratch[...] = jnp.einsum(
            'hmc,hcd->hmd', ctx_b, wk_ref[...],
            preferred_element_type=jnp.float32).astype(k_scratch.dtype)
        v_scratch[...] = jnp.einsum(
            'hmc,hcd->hmd', ctx_b, wv_ref[...],
            preferred_element_type=jnp.float32).astype(v_scratch.dtype)

    x = x_ref[0]                                                    # (tn, C_in)
    x_b = jnp.broadcast_to(x[None], (num_heads,) + x.shape)         # (H, tn, C_in)

    # Query projection; 1/sqrt(d_qk) already folded into wq on the host.
    q = jnp.einsum('hnc,hcd->hnd', x_b, wq_ref[...],
                   preferred_element_type=jnp.float32).astype(dt)   # (H, tn, d_qk)

    k = k_scratch[...]                                              # (H, M, d_qk)
    v = v_scratch[...]                                              # (H, M, d_v)

    # Head-batched scaled dot-product attention, softmax over keys (f32 stats).
    s = jnp.einsum('hnd,hmd->hnm', q, k,
                   preferred_element_type=jnp.float32)              # (H, tn, M)
    s = s - jnp.max(s, axis=-1, keepdims=True)
    p = jnp.exp(s)
    l = jnp.sum(p, axis=-1, keepdims=True)                          # (H, tn, 1)

    o = jnp.einsum('hnm,hmd->hnd', p.astype(dt), v,
                   preferred_element_type=jnp.float32)              # (H, tn, d_v)
    o = o * pl.reciprocal(l, approx=True)                           # softmax denom on EUP

    # Single bulk store of the whole (H, tn, d_v) slab.
    out_ref[0] = o.astype(out_ref.dtype)


def _choose_query_tile(n):
    if n <= 512:
        return n
    for t in (512, 256, 128):
        if n % t == 0:
            return t
    return n  # TODO(synk): pad N to enable ragged query tiling


class AttentionPallas:
    """Mirrors Attention(input_shape, num_heads, ...) with channels_first=True."""

    def __init__(self, input_shape=(32,), num_heads=None, context_dim=None,
                 query_key_dim=None, value_dim=None, key=None):
        self.input_dim = input_shape if isinstance(input_shape, int) else input_shape[0]
        self.context_dim = context_dim or self.input_dim
        self.query_key_dim = query_key_dim or self.input_dim
        self.value_dim = value_dim or self.input_dim
        self.num_heads = num_heads or math.gcd(math.gcd(16, self.value_dim),
                                               self.query_key_dim)
        assert self.value_dim % self.num_heads == 0
        assert self.query_key_dim % self.num_heads == 0

        key = key if key is not None else jax.random.PRNGKey(0)
        k1, k2 = jax.random.split(key)
        # nn.Linear(bias=False) style init: U(-1/sqrt(fan_in), 1/sqrt(fan_in)).
        bq = 1.0 / math.sqrt(self.input_dim)
        bkv = 1.0 / math.sqrt(self.context_dim)
        # Stored pre-transposed: (in_features, out_features), kv fused like the module.
        self.wq_t = jax.random.uniform(
            k1, (self.input_dim, self.query_key_dim), jnp.float32, -bq, bq)
        self.wkv_t = jax.random.uniform(
            k2, (self.context_dim, self.query_key_dim + self.value_dim),
            jnp.float32, -bkv, bkv)

        H = self.num_heads
        dqk = self.query_key_dim // H
        dv = self.value_dim // H
        scale = dqk ** (-0.5)
        # Head-major kernel weights. Linear output columns are grouped '(h d)',
        # so split the output dim and move heads to the front (host-side XLA).
        self.wq_hm = (self.wq_t * scale).reshape(
            self.input_dim, H, dqk).transpose(1, 0, 2)               # (H, C_in, dqk)
        wk_t = self.wkv_t[:, :self.query_key_dim]
        wv_t = self.wkv_t[:, self.query_key_dim:]
        self.wk_hm = wk_t.reshape(self.context_dim, H, dqk).transpose(1, 0, 2)
        self.wv_hm = wv_t.reshape(self.context_dim, H, dv).transpose(1, 0, 2)

    def __call__(self, x, context=None):
        # x: (B, C_in, *spatial), channels-first like the PyTorch module.
        if context is None:
            context = x
        spatial = x.shape[2:]

        x_cl = jnp.moveaxis(x, 1, -1)           # (B, *spatial, C_in)
        c_cl = jnp.moveaxis(context, 1, -1)     # (B, *spatial_c, C_ctx)
        B = x_cl.shape[0]
        x_flat = x_cl.reshape(B, -1, x_cl.shape[-1])    # (B, N, C_in)
        c_flat = c_cl.reshape(B, -1, c_cl.shape[-1])    # (B, M, C_ctx)

        N, C_in = x_flat.shape[1], x_flat.shape[2]
        M, C_ctx = c_flat.shape[1], c_flat.shape[2]
        H = self.num_heads
        dqk = self.query_key_dim // H
        dv = self.value_dim // H
        dt = x_flat.dtype

        tn = _choose_query_tile(N)
        n_tiles = N // tn

        # Feed the MXU operands in the input dtype (bf16 stays bf16).
        wq = self.wq_hm.astype(dt)
        wk = self.wk_hm.astype(dt)
        wv = self.wv_hm.astype(dt)

        out_hm = pl.pallas_call(
            _mhdpa_kernel,
            out_shape=jax.ShapeDtypeStruct((B, H, N, dv), dt),
            grid=(B, n_tiles),
            in_specs=[
                pl.BlockSpec((1, tn, C_in), lambda b, n: (b, n, 0)),
                pl.BlockSpec((1, M, C_ctx), lambda b, n: (b, 0, 0)),
                pl.BlockSpec((H, C_in, dqk), lambda b, n: (0, 0, 0)),
                pl.BlockSpec((H, C_ctx, dqk), lambda b, n: (0, 0, 0)),
                pl.BlockSpec((H, C_ctx, dv), lambda b, n: (0, 0, 0)),
            ],
            out_specs=pl.BlockSpec((1, H, tn, dv), lambda b, n: (b, 0, n, 0)),
            scratch_shapes=[
                pltpu.VMEM((H, M, dqk), dt),   # K, resident per batch element
                pltpu.VMEM((H, M, dv), dt),    # V, resident per batch element
            ],
            compiler_params=pltpu.CompilerParams(
                # batch axis parallel (megacore / v7x 2 TCs); query-tile axis
                # must stay sequential so the KV-scratch init at tile 0 is valid.
                dimension_semantics=("parallel", "arbitrary"),
                vmem_limit_bytes=32 * 1024 * 1024,   # safe on v5e/v6e/v7x
            ),
        )(x_flat, c_flat, wq, wk, wv)

        # 'b h n d -> b n (h d)': wrapper-side layout plumbing (cheap XLA).
        out_flat = jnp.transpose(out_hm, (0, 2, 1, 3)).reshape(B, N, self.value_dim)
        out = out_flat.reshape(B, *spatial, self.value_dim)   # (B, *spatial, Dv)
        return jnp.moveaxis(out, -1, 1)                       # (B, Dv, *spatial)

    # Pure-JAX reference (uses the original fused weights) for correctness checks.
    def reference(self, x, context=None):
        if context is None:
            context = x
        spatial = x.shape[2:]
        x_cl = jnp.moveaxis(x, 1, -1).reshape(x.shape[0], -1, self.input_dim)
        c_cl = jnp.moveaxis(context, 1, -1).reshape(x.shape[0], -1, self.context_dim)
        q = x_cl @ self.wq_t
        kv = c_cl @ self.wkv_t
        k, v = kv[..., :self.query_key_dim], kv[..., self.query_key_dim:]
        H = self.num_heads
        B, N, _ = q.shape
        M = k.shape[1]
        dqk = self.query_key_dim // H
        dv = self.value_dim // H
        qh = q.reshape(B, N, H, dqk).transpose(0, 2, 1, 3) * dqk ** -0.5
        kh = k.reshape(B, M, H, dqk).transpose(0, 2, 1, 3)
        vh = v.reshape(B, M, H, dv).transpose(0, 2, 1, 3)
        s = jnp.einsum('bhid,bhjd->bhij', qh, kh)
        p = jax.nn.softmax(s, axis=-1)
        o = jnp.einsum('bhij,bhjd->bhid', p, vh)
        o = o.transpose(0, 2, 1, 3).reshape(B, N, self.value_dim)
        o = o.reshape(B, *spatial, self.value_dim)
        return jnp.moveaxis(o, -1, 1)


if __name__ == "__main__":
    key = jax.random.PRNGKey(0)
    k_param, k_x, k_c = jax.random.split(key, 3)

    # Small shapes: batch=2, channels=32, spatial(seq)=8; 4 heads (head_dim=8).
    B, C, L = 2, 32, 8
    x = jax.random.normal(k_x, (B, C, L), dtype=jnp.float32)

    attn = AttentionPallas(input_shape=(C,), num_heads=4, key=k_param)

    # Self-attention (context=None).
    out = jax.block_until_ready(attn(x))
    assert out.shape == (B, attn.value_dim, L), out.shape
    ref = attn.reference(x)
    err = jnp.max(jnp.abs(out - ref))
    assert jnp.allclose(out, ref, atol=2e-3, rtol=2e-3), f"max err {err}"

    # Cross-attention with a context of a different length.
    Lc = 16
    ctx = jax.random.normal(k_c, (B, C, Lc), dtype=jnp.float32)
    out_x = jax.block_until_ready(attn(x, ctx))
    assert out_x.shape == (B, attn.value_dim, L), out_x.shape
    ref_x = attn.reference(x, ctx)
    err_x = jnp.max(jnp.abs(out_x - ref_x))
    assert jnp.allclose(out_x, ref_x, atol=2e-3, rtol=2e-3), f"max err {err_x}"

    print("KERNEL_OK")
</pallas_src>

<mosaic_0001>
module attributes {stable_mosaic.version = 11 : i64} {
  func.func @_mhdpa_kernel(%arg0: i32, %arg1: i32, %arg2: memref<1x8x32xf32, #tpu.memory_space<vmem>>, %arg3: memref<1x8x32xf32, #tpu.memory_space<vmem>>, %arg4: memref<4x32x8xf32, #tpu.memory_space<vmem>>, %arg5: memref<4x32x8xf32, #tpu.memory_space<vmem>>, %arg6: memref<4x32x8xf32, #tpu.memory_space<vmem>>, %arg7: memref<1x4x8x8xf32, #tpu.memory_space<vmem>>, %arg8: memref<4x8x8xf32, #tpu.memory_space<vmem>>, %arg9: memref<4x8x8xf32, #tpu.memory_space<vmem>>) attributes {dimension_semantics = [#tpu.dimension_semantics<parallel>, #tpu.dimension_semantics<arbitrary>], iteration_bounds = array<i64: 2, 1>, scalar_prefetch = 0 : i64, scratch_operands = 2 : i64, tpu.core_type = #tpu.core_type<tc>, window_params = [{transform_indices = @transform_0, window_bounds = array<i64: 1, 8, 32>}, {transform_indices = @transform_1, window_bounds = array<i64: 1, 8, 32>}, {pipeline_mode = #tpu.pipeline_mode<synchronous>, transform_indices = @transform_2, window_bounds = array<i64: 4, 32, 8>}, {pipeline_mode = #tpu.pipeline_mode<synchronous>, transform_indices = @transform_3, window_bounds = array<i64: 4, 32, 8>}, {pipeline_mode = #tpu.pipeline_mode<synchronous>, transform_indices = @transform_4, window_bounds = array<i64: 4, 32, 8>}, {transform_indices = @transform_5, window_bounds = array<i64: 1, 4, 8, 8>}]} {
    %c0_i32 = arith.constant 0 : i32
    %0 = arith.cmpi eq, %arg1, %c0_i32 : i32
    %1 = arith.extui %0 : i1 to i32
    %c0_i32_0 = arith.constant 0 : i32
    %2 = arith.cmpi ne, %1, %c0_i32_0 : i32
    scf.if %2 {
      %c0_20 = arith.constant 0 : index
      %c0_21 = arith.constant 0 : index
      %c0_22 = arith.constant 0 : index
      %27 = vector.load %arg3[%c0_20, %c0_21, %c0_22] : memref<1x8x32xf32, #tpu.memory_space<vmem>>, vector<1x8x32xf32>
      %28 = vector.shape_cast %27 : vector<1x8x32xf32> to vector<8x32xf32>
      %29 = vector.shape_cast %28 : vector<8x32xf32> to vector<1x8x32xf32>
      %30 = vector.shape_cast %29 : vector<1x8x32xf32> to vector<1x8x32xf32>
      %31 = vector.broadcast %30 : vector<1x8x32xf32> to vector<4x8x32xf32>
      %c0_23 = arith.constant 0 : index
      %c0_24 = arith.constant 0 : index
      %c0_25 = arith.constant 0 : index
      %32 = vector.load %arg5[%c0_23, %c0_24, %c0_25] : memref<4x32x8xf32, #tpu.memory_space<vmem>>, vector<4x32x8xf32>
      "tpu.trace_start"() <{level = 10 : i32, message = "hmc,hcd->hmd"}> : () -> ()
      %cst_26 = arith.constant dense<0.000000e+00> : vector<4x8x8xf32>
      %33 = tpu.matmul %31, %32, %cst_26 {dimension_numbers = #tpu.dot_dimension_numbers<[2], [1], [1], [2], [0, 0, 0, 1, 1, 2], [0], [0]>} : vector<4x8x32xf32>, vector<4x32x8xf32>, vector<4x8x8xf32> -> vector<4x8x8xf32>
      "tpu.trace_stop"() : () -> ()
      %c0_27 = arith.constant 0 : index
      %c0_28 = arith.constant 0 : index
      %c0_29 = arith.constant 0 : index
      %34 = vector.load %arg8[%c0_27, %c0_28, %c0_29] : memref<4x8x8xf32, #tpu.memory_space<vmem>>, vector<4x8x8xf32>
      tpu.vector_store %arg8[%c0_27, %c0_28, %c0_29], %33 {strides = array<i32>} : memref<4x8x8xf32, #tpu.memory_space<vmem>>, vector<4x8x8xf32>,
      %c0_30 = arith.constant 0 : index
      %c0_31 = arith.constant 0 : index
      %c0_32 = arith.constant 0 : index
      %35 = vector.load %arg6[%c0_30, %c0_31, %c0_32] : memref<4x32x8xf32, #tpu.memory_space<vmem>>, vector<4x32x8xf32>
      "tpu.trace_start"() <{level = 10 : i32, message = "hmc,hcd->hmd"}> : () -> ()
      %cst_33 = arith.constant dense<0.000000e+00> : vector<4x8x8xf32>
      %36 = tpu.matmul %31, %35, %cst_33 {dimension_numbers = #tpu.dot_dimension_numbers<[2], [1], [1], [2], [0, 0, 0, 1, 1, 2], [0], [0]>} : vector<4x8x32xf32>, vector<4x32x8xf32>, vector<4x8x8xf32> -> vector<4x8x8xf32>
      "tpu.trace_stop"() : () -> ()
      %c0_34 = arith.constant 0 : index
      %c0_35 = arith.constant 0 : index
      %c0_36 = arith.constant 0 : index
      %37 = vector.load %arg9[%c0_34, %c0_35, %c0_36] : memref<4x8x8xf32, #tpu.memory_space<vmem>>, vector<4x8x8xf32>
      tpu.vector_store %arg9[%c0_34, %c0_35, %c0_36], %36 {strides = array<i32>} : memref<4x8x8xf32, #tpu.memory_space<vmem>>, vector<4x8x8xf32>,
    } else {
    }
    %c0 = arith.constant 0 : index
    %c0_1 = arith.constant 0 : index
    %c0_2 = arith.constant 0 : index
    %3 = vector.load %arg2[%c0, %c0_1, %c0_2] : memref<1x8x32xf32, #tpu.memory_space<vmem>>, vector<1x8x32xf32>
    %4 = vector.shape_cast %3 : vector<1x8x32xf32> to vector<8x32xf32>
    %5 = vector.shape_cast %4 : vector<8x32xf32> to vector<1x8x32xf32>
    %6 = vector.shape_cast %5 : vector<1x8x32xf32> to vector<1x8x32xf32>
    %7 = vector.broadcast %6 : vector<1x8x32xf32> to vector<4x8x32xf32>
    %c0_3 = arith.constant 0 : index
    %c0_4 = arith.constant 0 : index
    %c0_5 = arith.constant 0 : index
    %8 = vector.load %arg4[%c0_3, %c0_4, %c0_5] : memref<4x32x8xf32, #tpu.memory_space<vmem>>, vector<4x32x8xf32>
    "tpu.trace_start"() <{level = 10 : i32, message = "hnc,hcd->hnd"}> : () -> ()
    %cst = arith.constant dense<0.000000e+00> : vector<4x8x8xf32>
    %9 = tpu.matmul %7, %8, %cst {dimension_numbers = #tpu.dot_dimension_numbers<[2], [1], [1], [2], [0, 0, 0, 1, 1, 2], [0], [0]>} : vector<4x8x32xf32>, vector<4x32x8xf32>, vector<4x8x8xf32> -> vector<4x8x8xf32>
    "tpu.trace_stop"() : () -> ()
    %c0_6 = arith.constant 0 : index
    %c0_7 = arith.constant 0 : index
    %c0_8 = arith.constant 0 : index
    %10 = vector.load %arg8[%c0_6, %c0_7, %c0_8] : memref<4x8x8xf32, #tpu.memory_space<vmem>>, vector<4x8x8xf32>
    %c0_9 = arith.constant 0 : index
    %c0_10 = arith.constant 0 : index
    %c0_11 = arith.constant 0 : index
    %11 = vector.load %arg9[%c0_9, %c0_10, %c0_11] : memref<4x8x8xf32, #tpu.memory_space<vmem>>, vector<4x8x8xf32>
    "tpu.trace_start"() <{level = 10 : i32, message = "hnd,hmd->hnm"}> : () -> ()
    %cst_12 = arith.constant dense<0.000000e+00> : vector<4x8x8xf32>
    %12 = tpu.matmul %9, %10, %cst_12 {dimension_numbers = #tpu.dot_dimension_numbers<[2], [2], [1], [1], [0, 0, 0, 1, 1, 1], [0], [0]>} : vector<4x8x8xf32>, vector<4x8x8xf32>, vector<4x8x8xf32> -> vector<4x8x8xf32>
    "tpu.trace_stop"() : () -> ()
    %cst_13 = arith.constant dense<0xFF800000> : vector<4x8xf32>
    %13 = vector.multi_reduction <maximumf>, %12, %cst_13 [2] : vector<4x8x8xf32> to vector<4x8xf32>
    %14 = vector.shape_cast %13 : vector<4x8xf32> to vector<4x8x1xf32>
    %15 = vector.broadcast %14 : vector<4x8x1xf32> to vector<4x8x8xf32>
    %16 = arith.subf %12, %15 : vector<4x8x8xf32>
    %17 = math.exp %16 : vector<4x8x8xf32>
    %cst_14 = arith.constant dense<0.000000e+00> : vector<4x8xf32>
    %18 = vector.multi_reduction <add>, %17, %cst_14 [2] : vector<4x8x8xf32> to vector<4x8xf32>
    %19 = vector.shape_cast %18 : vector<4x8xf32> to vector<4x8x1xf32>
    "tpu.trace_start"() <{level = 10 : i32, message = "hnm,hmd->hnd"}> : () -> ()
    %cst_15 = arith.constant dense<0.000000e+00> : vector<4x8x8xf32>
    %20 = tpu.matmul %17, %11, %cst_15 {dimension_numbers = #tpu.dot_dimension_numbers<[2], [1], [1], [2], [0, 0, 0, 1, 1, 2], [0], [0]>} : vector<4x8x8xf32>, vector<4x8x8xf32>, vector<4x8x8xf32> -> vector<4x8x8xf32>
    "tpu.trace_stop"() : () -> ()
    %21 = tpu.reciprocal %19 {approx = true} : vector<4x8x1xf32> -> vector<4x8x1xf32>
    %22 = vector.broadcast %21 : vector<4x8x1xf32> to vector<4x8x8xf32>
    %23 = arith.mulf %20, %22 : vector<4x8x8xf32>
    %c0_16 = arith.constant 0 : index
    %c0_17 = arith.constant 0 : index
    %c0_18 = arith.constant 0 : index
    %c0_19 = arith.constant 0 : index
    %24 = vector.load %arg7[%c0_16, %c0_17, %c0_18, %c0_19] : memref<1x4x8x8xf32, #tpu.memory_space<vmem>>, vector<1x4x8x8xf32>
    %25 = vector.shape_cast %24 : vector<1x4x8x8xf32> to vector<4x8x8xf32>
    %26 = vector.shape_cast %23 : vector<4x8x8xf32> to vector<1x4x8x8xf32>
    tpu.vector_store %arg7[%c0_16, %c0_17, %c0_18, %c0_19], %26 {strides = array<i32>} : memref<1x4x8x8xf32, #tpu.memory_space<vmem>>, vector<1x4x8x8xf32>,
    return
  }
  func.func @transform_0(%arg0: i32, %arg1: i32) -> (i32, i32, i32) {
    %c0_i32 = arith.constant 0 : i32
    %c0_i32_0 = arith.constant 0 : i32
    return %arg0, %arg1, %c0_i32 : i32, i32, i32
  }
  func.func @transform_1(%arg0: i32, %arg1: i32) -> (i32, i32, i32) {
    %c0_i32 = arith.constant 0 : i32
    %c0_i32_0 = arith.constant 0 : i32
    %c0_i32_1 = arith.constant 0 : i32
    return %arg0, %c0_i32, %c0_i32_0 : i32, i32, i32
  }
  func.func @transform_2(%arg0: i32, %arg1: i32) -> (i32, i32, i32) {
    %c0_i32 = arith.constant 0 : i32
    %c0_i32_0 = arith.constant 0 : i32
    %c0_i32_1 = arith.constant 0 : i32
    %c0_i32_2 = arith.constant 0 : i32
    return %c0_i32, %c0_i32_0, %c0_i32_1 : i32, i32, i32
  }
  func.func @transform_3(%arg0: i32, %arg1: i32) -> (i32, i32, i32) {
    %c0_i32 = arith.constant 0 : i32
    %c0_i32_0 = arith.constant 0 : i32
    %c0_i32_1 = arith.constant 0 : i32
    %c0_i32_2 = arith.constant 0 : i32
    return %c0_i32, %c0_i32_0, %c0_i32_1 : i32, i32, i32
  }
  func.func @transform_4(%arg0: i32, %arg1: i32) -> (i32, i32, i32) {
    %c0_i32 = arith.constant 0 : i32
    %c0_i32_0 = arith.constant 0 : i32
    %c0_i32_1 = arith.constant 0 : i32
    %c0_i32_2 = arith.constant 0 : i32
    return %c0_i32, %c0_i32_0, %c0_i32_1 : i32, i32, i32
  }
  func.func @transform_5(%arg0: i32, %arg1: i32) -> (i32, i32, i32, i32) {
    %c0_i32 = arith.constant 0 : i32
    %c0_i32_0 = arith.constant 0 : i32
    %c0_i32_1 = arith.constant 0 : i32
    return %arg0, %c0_i32, %arg1, %c0_i32_0 : i32, i32, i32, i32
  }
}

</mosaic_0001>

<bundles_post_ra>
// kernel: tpu_custom_call.1
= control target key start
LH: loop header
LB: loop body
LE: loop exit
PB: predicated region body
PF: predicated region fallthrough
CT: control target
= control target key end

     0   :  { %10 = vsyncpa [#allocation5], 0  ;;  %s2824_s0 = inlined_call_operand.vmem [shape: f32[2,8,32], index: 0, kind: input, shape index: {}]   ;;  %s2825_s1 = inlined_call_operand.vmem [shape: f32[2,8,32], index: 1, kind: input, shape index: {}]   ;;  %s2826_s2 = inlined_call_operand.vmem [shape: f32[4,32,8], index: 2, kind: input, shape index: {}]   ;;  %s2827_s3 = inlined_call_operand.vmem [shape: f32[4,32,8], index: 3, kind: input, shape index: {}]   ;;  %s2828_s4 = inlined_call_operand.vmem [shape: f32[4,32,8], index: 4, kind: input, shape index: {}]   ;;  %s2829_s5 = inlined_call_operand.hbm [shape: f32[2,4,8,8], index: 5, kind: output, shape index: {}]  }
   0x1   :  { %12 = vsyncpa [#allocation5 + $0x1], 0  ;;  %s2402_s18 = smov 0   ;;  %s2404_s19 = smov 0  }
   0x2   :  { %s2406_s20 = smov 0   ;;  %s2408_s21 = smov 0  }
   0x3   :  { %s2410_s22 = smov 0   ;;  %s2412_s23 = smov 0  }
   0x4 LB: > { %s1928_s24 = sadd.s32 4294967295, %s2365_s23   ;;  %s1929_s25 = sadd.s32 4294967294, %s2365_s23   ;;  %s2365_s23 = sphi %s2412_s23, %s18_s23   ;;  %s2361_s22 = sphi %s2410_s22, %s2836_s22   ;;  %s2357_s21 = sphi %s2408_s21, %s2835_s21   ;;  %s2353_s20 = sphi %s2406_s20, %s2834_s20   ;;  %s2349_s19 = sphi %s2404_s19, %s2833_s19   ;;  %s2345_s18 = sphi %s2402_s18, %s2832_s18  }
   0x5   : > { %s30_s26 = sadd.s32 1, %s2361_s22  ;;  %s156_s27 = sadd.s32 1, %s2353_s20 }
   0x6   : > { %p32_p0 = scmp.ge.s32.totalorder %s30_s26, 2  ;;  %p166_p1 = scmp.ne.s32.totalorder %s2353_s20, %s2349_s19 }
   0x7   : > { %p167_p2 = scmp.eq.s32.totalorder %s1928_s24, 1  ;;  %p172_p3 = scmp.ne.s32.totalorder %s2349_s19, %s2345_s18 }
   0x8   : > { %s2838_s26 = smov (%p32_p0, %s30_s26), 0  ;;  %p173_p5 = scmp.eq.s32.totalorder %s1929_s25, 1 }
   0x9   : > { %p2442_p4 = por %p167_p2, %p166_p1  ;;  %s151_s29 = ssub.s32 %s2361_s22, %s2838_s26 }
   0xa   : > { %p1932_p6 = scmp.ge.s32.totalorder %s2365_s23, 1  ;;  %p154_p7 = scmp.eq.s32.totalorder %s151_s29, 0 }
   0xb   : > { %p2449_p8 = por %p173_p5, %p172_p3  ;;  %p217_p9 = scmp.lt.s32.totalorder %s2365_s23, 3 }
   0xc   : > { %s2455_s6 = scalar_select %p154_p7, %s2353_s20, %s156_s27  }
   0xd   : > { %p218_p10 = pnand %p1932_p6, %p217_p9 }
   0xe   : > { %p251_p11 = scmp.lt.s32.totalorder (!%p218_p10), %s2357_s21, 1  ;;  %s1965_s25 = sshll.u32 (!%p218_p10), %s2357_s21, 9 }
   0xf   : > { %221 = sbr.rel (%p218_p10) target bundleno = 836 (0x344), region = 40  ;;  %s2774_s8 = scalar_lea.hbm (!%p218_p10), %s2829_s5, %s1965_s25 }
  0x14   : > { %v270_v0 = vld [vmem:[%s2827_s3 + $0x18] sm:$0xff]  ;;  %v2367_v2 = vmov 0.0   ;;  %v269_v3 = vld [vmem:[%s2827_s3 + $0x10] sm:$0xff]  ;;  %s2473_s15 = scalar_select %p251_p11, %s2357_s21, 1  ;;  %v268_v5 = vld [vmem:[%s2827_s3 + $0x8] sm:$0xff]  ;;  %vm283_vm0 = vcmask 261120  }
  0x15   : > { %v274_v1 = vld [vmem:[%s2827_s3 + $0x38] sm:$0xff]  ;;  %2042 = vmatprep.subr.mxu0 %v2367_v2  ;;  %2053 = vmatprep.subr.mxu1 %v2367_v2  ;;  %v273_v4 = vld [vmem:[%s2827_s3 + $0x30] sm:$0xff]  ;;  %v272_v6 = vld [vmem:[%s2827_s3 + $0x28] sm:$0xff]  ;;  %vm2368_vm1 = vmmov 0   ;;  %vm567_vm2 = vcmask 64512  }
  0x16   : > { %2043 = vmatpush3.msra.mxu0 %v270_v0  ;;  %2054 = vmatpush3.msra.mxu1 %v274_v1  ;;  %s1934_s27 = sshll.u32 %s2473_s15, 3  ;;  %v267_v7 = vld [vmem:[%s2827_s3] sm:$0xff]  ;;  %v278_v10 = vld [vmem:[%s2827_s3 + $0x58] sm:$0xff]  ;;  %v277_v12 = vld [vmem:[%s2827_s3 + $0x50] sm:$0xff] }
  0x17   : > { %2044 = vmatprep.subr.mxu0 %v2367_v2  ;;  %2055 = vmatprep.subr.mxu1 %v2367_v2  ;;  %s261_s10 = scalar_lea.vmem %s2825_s1, %s1934_s27  ;;  %v271_v8 = vld [vmem:[%s2827_s3 + $0x20] sm:$0xff]  ;;  %v282_v11 = vld [vmem:[%s2827_s3 + $0x78] sm:$0xff]  ;;  %v281_v13 = vld [vmem:[%s2827_s3 + $0x70] sm:$0xff] }
  0x18   : > { %2045 = vmatpush3.msra.mxu0 %v269_v3  ;;  %2056 = vmatpush3.msra.mxu1 %v273_v4  ;;  %v2497_v9 = vld [vmem:[%s261_s10] sm:$0xff]  ;;  %v276_v14 = vld [vmem:[%s2827_s3 + $0x48] sm:$0xff]  ;;  %v575_v18 = vld [vmem:[%s2828_s4 + $0x18] sm:$0xff]  ;;  %s257_s10 = scalar_lea.vmem %s2824_s0, %s1934_s27  ;;  %s248_s27 = sand.u32 1, %s2349_s19  }
  0x19   : > { %2046 = vmatprep.subr.mxu0 %v2367_v2  ;;  %2057 = vmatprep.subr.mxu1 %v2367_v2  ;;  %v280_v15 = vld [vmem:[%s2827_s3 + $0x68] sm:$0xff]  ;;  %v275_v16 = vld [vmem:[%s2827_s3 + $0x40] sm:$0xff]  ;;  %v579_v19 = vld [vmem:[%s2828_s4 + $0x38] sm:$0xff]  ;;  %s1933_s16 = sshll.u32 %s248_s27, 5  ;;  %s2779_s21 = scalar_lea.sflag [#allocation5], %s248_s27 }
  0x1a   : > { %2047 = vmatpush3.msra.mxu0 %v268_v5  ;;  %2058 = vmatpush3.msra.mxu1 %v272_v6  ;;  %v279_v17 = vld [vmem:[%s2827_s3 + $0x60] sm:$0xff]  ;;  %v574_v20 = vld [vmem:[%s2828_s4 + $0x10] sm:$0xff]  ;;  %v573_v22 = vld [vmem:[%s2828_s4 + $0x8] sm:$0xff]  ;;  %s250_s17 = scalar_lea.vmem [#allocation4], %s1933_s16 }
  0x1b   : > { %2048 = vmatprep.subr.mxu0 %v2367_v2  ;;  %2059 = vmatprep.subr.mxu1 %v2367_v2  ;;  %v578_v21 = vld [vmem:[%s2828_s4 + $0x30] sm:$0xff]  ;;  %v577_v23 = vld [vmem:[%s2828_s4 + $0x28] sm:$0xff]  ;;  %v572_v24 = vld [vmem:[%s2828_s4] sm:$0xff]  ;;  %s1841_s24 = sshll.u32 %s250_s17, 4  ;;  %s2769_s24 = int_to_ptr.vmem [resolvable:$true] %s1841_s24 }
  0x1c   : > { %2049 = vmatpush3.msra.mxu0 %v267_v7  ;;  %2050 = vmatprep.mubr.msk.f32.mxu0 %vm2368_vm1, %v2367_v2  ;;  %v576_v25 = vld [vmem:[%s2828_s4 + $0x20] sm:$0xff]  ;;  %v583_v26 = vld [vmem:[%s2828_s4 + $0x58] sm:$0xff]  ;;  %v582_v28 = vld [vmem:[%s2828_s4 + $0x50] sm:$0xff]  ;;  %s2289_s9 = scalar_lea.vmem %s2769_s24, 512 }
  0x1d   : > { %2060 = vmatpush3.msra.mxu1 %v271_v8  ;;  %2051 = vmatmul.mubr.msk.f32.vlgmr.msra.gmra.mxu0 %vm283_vm0, %v2497_v9  ;;  %v587_v27 = vld [vmem:[%s2828_s4 + $0x78] sm:$0xff]  ;;  %v586_v29 = vld [vmem:[%s2828_s4 + $0x70] sm:$0xff]  ;;  %v581_v30 = vld [vmem:[%s2828_s4 + $0x48] sm:$0xff]  ;;  %p2290_p12 = scmp.ne.s32.totalorder %s2769_s24, %s2289_s9 }
  0x1e   : > { %2061 = vmatprep.mubr.msk.f32.mxu1 %vm2368_vm1, %v2367_v2  ;;  %2064 = vmatprep.subr.mxu0 %v2367_v2  ;;  %v585_v31 = vld [vmem:[%s2828_s4 + $0x68] sm:$0xff]  ;;  %v580_v32 = vld [vmem:[%s2828_s4 + $0x40] sm:$0xff]  ;;  %v876_v34 = vld [vmem:[%s2826_s2 + $0x18] sm:$0xff] }
  0x1f   : > { %2075 = vmatprep.subr.mxu1 %v2367_v2  ;;  %2062 = vmatmul.mubr.msk.f32.vlgmr.msra.gmra.mxu1 %vm283_vm0, %v2497_v9  ;;  %v584_v33 = vld [vmem:[%s2828_s4 + $0x60] sm:$0xff]  ;;  %v880_v35 = vld [vmem:[%s2826_s2 + $0x38] sm:$0xff]  ;;  %v875_v36 = vld [vmem:[%s2826_s2 + $0x10] sm:$0xff]  ;;  %p2291_p13 = pnand %p2290_p12, %p2442_p4 }
  0x20   : > { %2065 = vmatpush3.msra.mxu0 %v278_v10  ;;  %2076 = vmatpush3.msra.mxu1 %v282_v11  ;;  %v879_v37 = vld [vmem:[%s2826_s2 + $0x30] sm:$0xff]  ;;  %v874_v38 = vld [vmem:[%s2826_s2 + $0x8] sm:$0xff]  ;;  %v873_v40 = vld [vmem:[%s2826_s2] sm:$0xff] }
  0x21   : > { %2066 = vmatprep.subr.mxu0 %v2367_v2  ;;  %2077 = vmatprep.subr.mxu1 %v2367_v2  ;;  %v878_v39 = vld [vmem:[%s2826_s2 + $0x28] sm:$0xff]  ;;  %v877_v41 = vld [vmem:[%s2826_s2 + $0x20] sm:$0xff]  ;;  %v884_v43 = vld [vmem:[%s2826_s2 + $0x58] sm:$0xff]  ;;  %p2292_p0 = pneg %p2291_p13 }
  0x22   : > { %2067 = vmatpush3.msra.mxu0 %v277_v12  ;;  %2078 = vmatpush3.msra.mxu1 %v281_v13  ;;  %v872_v42 = vld [vmem:[%s257_s10] sm:$0xff]  ;;  %v888_v44 = vld [vmem:[%s2826_s2 + $0x78] sm:$0xff]  ;;  %v883_v45 = vld [vmem:[%s2826_s2 + $0x50] sm:$0xff]  ;;  %s2369_s10 = smov [#allocation4]  }
  0x23   : > { %2068 = vmatprep.subr.mxu0 %v2367_v2  ;;  %2079 = vmatprep.subr.mxu1 %v2367_v2  ;;  %v887_v46 = vld [vmem:[%s2826_s2 + $0x70] sm:$0xff]  ;;  %v882_v47 = vld [vmem:[%s2826_s2 + $0x48] sm:$0xff]  ;;  %v881_v49 = vld [vmem:[%s2826_s2 + $0x40] sm:$0xff]  ;;  %s2293_s11 = sshll.u32 %s2369_s10, 4  ;;  %s2294_s11 = int_to_ptr.vmem [resolvable:$false] %s2293_s11 }
  0x24   : > { %2069 = vmatpush3.msra.mxu0 %v276_v14  ;;  %2080 = vmatpush3.msra.mxu1 %v280_v15  ;;  %v886_v48 = vld [vmem:[%s2826_s2 + $0x68] sm:$0xff]  ;;  %v885_v50 = vld [vmem:[%s2826_s2 + $0x60] sm:$0xff]  ;;  %s2295_s12 = scalar_lea.vmem %s2294_s11, 1024  ;;  %p2296_p1 = scmp.lt.s32.totalorder %s2769_s24, %s2294_s11 }
  0x25   : > { %2070 = vmatprep.subr.mxu0 %v2367_v2  ;;  %2081 = vmatprep.subr.mxu1 %v2367_v2  ;;  %p2297_p2 = scmp.lt.s32.totalorder %s2295_s12, %s2289_s9 }
  0x26   : > { %2071 = vmatpush3.msra.mxu0 %v275_v16  ;;  %2072 = vmatprep.mubr.msk.f32.mxu0 %vm2368_vm1, %v2367_v2 }
  0x27   : > { %2082 = vmatpush3.msra.mxu1 %v279_v17  ;;  %2073 = vmatmul.mubr.msk.f32.vlgmr.msra.gmra.mxu0 %vm283_vm0, %v2497_v9  ;;  %p2298_p3 = por %p2297_p2, %p2296_p1 }
  0x28   : > { %2083 = vmatprep.mubr.msk.f32.mxu1 %vm2368_vm1, %v2367_v2  ;;  %2086 = vmatprep.subr.mxu0 %v2367_v2 }
  0x29   : > { %2097 = vmatprep.subr.mxu1 %v2367_v2  ;;  %2084 = vmatmul.mubr.msk.f32.vlgmr.msra.gmra.mxu1 %vm283_vm0, %v2497_v9  ;;  %p2299_p5 = pnand %p2298_p3, %p2292_p0 }
  0x2a   : > { %2087 = vmatpush3.msra.mxu0 %v575_v18  ;;  %2098 = vmatpush3.msra.mxu1 %v579_v19 }
  0x2b   : > { %2088 = vmatprep.subr.mxu0 %v2367_v2  ;;  %2099 = vmatprep.subr.mxu1 %v2367_v2 }
  0x2c   : > { %2089 = vmatpush3.msra.mxu0 %v574_v20  ;;  %2100 = vmatpush3.msra.mxu1 %v578_v21 }
  0x2d   : > { %2090 = vmatprep.subr.mxu0 %v2367_v2  ;;  %2101 = vmatprep.subr.mxu1 %v2367_v2 }
  0x2e   : > { %2091 = vmatpush3.msra.mxu0 %v573_v22  ;;  %2102 = vmatpush3.msra.mxu1 %v577_v23 }
  0x2f   : > { %2092 = vmatprep.subr.mxu0 %v2367_v2  ;;  %2103 = vmatprep.subr.mxu1 %v2367_v2 }
  0x30   : > { %2093 = vmatpush3.msra.mxu0 %v572_v24  ;;  %2094 = vmatprep.mubr.msk.f32.mxu0 %vm2368_vm1, %v2367_v2 }
  0x31   : > { %2104 = vmatpush3.msra.mxu1 %v576_v25  ;;  %2095 = vmatmul.mubr.msk.f32.vlgmr.msra.gmra.mxu0 %vm283_vm0, %v2497_v9 }
  0x32   : > { %2105 = vmatprep.mubr.msk.f32.mxu1 %vm2368_vm1, %v2367_v2  ;;  %2108 = vmatprep.subr.mxu0 %v2367_v2 }
  0x33   : > { %2119 = vmatprep.subr.mxu1 %v2367_v2  ;;  %2106 = vmatmul.mubr.msk.f32.vlgmr.msra.gmra.mxu1 %vm283_vm0, %v2497_v9 }
  0x34   : > { %2109 = vmatpush3.msra.mxu0 %v583_v26  ;;  %2120 = vmatpush3.msra.mxu1 %v587_v27 }
  0x35   : > { %2110 = vmatprep.subr.mxu0 %v2367_v2  ;;  %2121 = vmatprep.subr.mxu1 %v2367_v2 }
  0x36   : > { %2111 = vmatpush3.msra.mxu0 %v582_v28  ;;  %2122 = vmatpush3.msra.mxu1 %v586_v29 }
  0x37   : > { %2112 = vmatprep.subr.mxu0 %v2367_v2  ;;  %2123 = vmatprep.subr.mxu1 %v2367_v2 }
  0x38   : > { %2113 = vmatpush3.msra.mxu0 %v581_v30  ;;  %2124 = vmatpush3.msra.mxu1 %v585_v31 }
  0x39   : > { %2114 = vmatprep.subr.mxu0 %v2367_v2  ;;  %2125 = vmatprep.subr.mxu1 %v2367_v2 }
  0x3a   : > { %2115 = vmatpush3.msra.mxu0 %v580_v32  ;;  %2116 = vmatprep.mubr.msk.f32.mxu0 %vm2368_vm1, %v2367_v2 }
  0x3b   : > { %2126 = vmatpush3.msra.mxu1 %v584_v33  ;;  %2117 = vmatmul.mubr.msk.f32.vlgmr.msra.gmra.mxu0 %vm283_vm0, %v2497_v9 }
  0x3c   : > { %2127 = vmatprep.mubr.msk.f32.mxu1 %vm2368_vm1, %v2367_v2  ;;  %2130 = vmatprep.subr.mxu0 %v2367_v2 }
  0x3d   : > { %2141 = vmatprep.subr.mxu1 %v2367_v2  ;;  %2128 = vmatmul.mubr.msk.f32.vlgmr.msra.gmra.mxu1 %vm283_vm0, %v2497_v9 }
  0x3e   : > { %2131 = vmatpush3.msra.mxu0 %v876_v34  ;;  %2142 = vmatpush3.msra.mxu1 %v880_v35 }
  0x3f   : > { %2132 = vmatprep.subr.mxu0 %v2367_v2  ;;  %2143 = vmatprep.subr.mxu1 %v2367_v2 }
  0x40   : > { %2133 = vmatpush3.msra.mxu0 %v875_v36  ;;  %2144 = vmatpush3.msra.mxu1 %v879_v37 }
  0x41   : > { %2134 = vmatprep.subr.mxu0 %v2367_v2  ;;  %2145 = vmatprep.subr.mxu1 %v2367_v2 }
  0x42   : > { %2135 = vmatpush3.msra.mxu0 %v874_v38  ;;  %2146 = vmatpush3.msra.mxu1 %v878_v39 }
  0x43   : > { %2136 = vmatprep.subr.mxu0 %v2367_v2  ;;  %2147 = vmatprep.subr.mxu1 %v2367_v2 }
  0x44   : > { %2137 = vmatpush3.msra.mxu0 %v873_v40  ;;  %2138 = vmatprep.mubr.msk.f32.mxu0 %vm2368_vm1, %v2367_v2 }
  0x45   : > { %2148 = vmatpush3.msra.mxu1 %v877_v41  ;;  %2149 = vmatprep.mubr.msk.f32.mxu1 %vm2368_vm1, %v2367_v2 }
  0x46   : > { %2139 = vmatmul.mubr.msk.f32.vlgmr.msra.gmra.mxu0 %vm283_vm0, %v872_v42  ;;  %2150 = vmatmul.mubr.msk.f32.vlgmr.msra.gmra.mxu1 %vm283_vm0, %v872_v42 }
  0x47   : > { %2152 = vmatprep.subr.mxu0 %v2367_v2  ;;  %2163 = vmatprep.subr.mxu1 %v2367_v2 }
  0x48   : > { %2153 = vmatpush3.msra.mxu0 %v884_v43  ;;  %2164 = vmatpush3.msra.mxu1 %v888_v44 }
  0x49   : > { %2154 = vmatprep.subr.mxu0 %v2367_v2  ;;  %2165 = vmatprep.subr.mxu1 %v2367_v2 }
  0x4a   : > { %2155 = vmatpush3.msra.mxu0 %v883_v45  ;;  %2166 = vmatpush3.msra.mxu1 %v887_v46 }
  0x4b   : > { %2156 = vmatprep.subr.mxu0 %v2367_v2  ;;  %2167 = vmatprep.subr.mxu1 %v2367_v2 }
  0x4c   : > { %2157 = vmatpush3.msra.mxu0 %v882_v47  ;;  %2168 = vmatpush3.msra.mxu1 %v886_v48 }
  0x4d   : > { %2158 = vmatprep.subr.mxu0 %v2367_v2  ;;  %2169 = vmatprep.subr.mxu1 %v2367_v2 }
  0x4e   : > { %2159 = vmatpush3.msra.mxu0 %v881_v49  ;;  %2160 = vmatprep.mubr.msk.f32.mxu0 %vm2368_vm1, %v2367_v2 }
  0x4f   : > { %2170 = vmatpush3.msra.mxu1 %v885_v50  ;;  %2171 = vmatprep.mubr.msk.f32.mxu1 %vm2368_vm1, %v2367_v2 }
  0x50   : > { %2161 = vmatmul.mubr.msk.f32.vlgmr.msra.gmra.mxu0 %vm283_vm0, %v872_v42  ;;  %2172 = vmatmul.mubr.msk.f32.vlgmr.msra.gmra.mxu1 %vm283_vm0, %v872_v42 }
  0x51   : > { %2174 = vmatprep.subr.mxu0 %v2367_v2  ;;  %2179 = vmatprep.subr.mxu1 %v2367_v2 }
  0x52   : > { %2176 = vmatprep.mubr.msk.f32.mxu0 %vm2368_vm1, %v2367_v2  ;;  %2181 = vmatprep.mubr.msk.f32.mxu1 %vm2368_vm1, %v2367_v2 }
  0xdd   : > { %v353_v51 = vpop.f32.mrf.mxu0 }
  0xde   : > { %568 = vst.msk [vmem:[#allocation2] sm:$0xff] %vm567_vm2, %v353_v51 }
  0xdf   : > { %v2052_v52 = vpop.f32.mrf.mxu0  ;;  %v423_v53 = vpop.f32.mrf.mxu1 }
  0xe0   : > { %569 = vst.msk [vmem:[#allocation2 + $0x8] sm:$0xff] %vm567_vm2, %v423_v53 }
  0xe1   : > { %v2063_v54 = vpop.f32.mrf.mxu1 }
  0xe5   : > { %v1173_v55 = vld [vmem:[#allocation2] sm:$0xff] }
  0xe6   : > { %2175 = vmatpush3.xpose.msk.msra.mxu0 %vm567_vm2, %v1173_v55 }
  0xe7   : > { %v493_v56 = vpop.f32.mrf.mxu0  ;;  %v1174_v57 = vld [vmem:[#allocation2 + $0x8] sm:$0xff]  ;;  %2184 = vmatprep.subr.mxu0 %v2367_v2 }
  0xe8   : > { %570 = vst.msk [vmem:[#allocation2 + $0x10] sm:$0xff] %vm567_vm2, %v493_v56  ;;  %2180 = vmatpush3.xpose.msk.msra.mxu1 %vm567_vm2, %v1174_v57 }
  0xe9   : > { %v2074_v58 = vpop.f32.mrf.mxu0  ;;  %v563_v59 = vpop.f32.mrf.mxu1  ;;  %2189 = vmatprep.subr.mxu1 %v2367_v2 }
  0xea   : > { %571 = vst.msk [vmem:[#allocation2 + $0x18] sm:$0xff] %vm567_vm2, %v563_v59 }
  0xeb   : > { %v2085_v60 = vpop.f32.mrf.mxu1 }
  0xef   : > { %v1175_v8 = vld [vmem:[#allocation2 + $0x10] sm:$0xff] }
  0xf1   : > { %v654_v61 = vpop.f32.mrf.mxu0  ;;  %v1176_v9 = vld [vmem:[#allocation2 + $0x18] sm:$0xff] }
  0xf2   : > { %868 = vst.msk [vmem:[#allocation3] sm:$0xff] %vm567_vm2, %v654_v61 }
  0xf3   : > { %v2096_v62 = vpop.f32.mrf.mxu0  ;;  %v724_v63 = vpop.f32.mrf.mxu1 }
  0xf4   : > { %869 = vst.msk [vmem:[#allocation3 + $0x8] sm:$0xff] %vm567_vm2, %v724_v63 }
  0xf5   : > { %v2107_v0 = vpop.f32.mrf.mxu1 }
  0xf9   : > { %v1177_v14 = vld [vmem:[#allocation3] sm:$0xff] }
  0xfb   : > { %v794_v1 = vpop.f32.mrf.mxu0  ;;  %v1178_v15 = vld [vmem:[#allocation3 + $0x8] sm:$0xff] }
  0xfc   : > { %870 = vst.msk [vmem:[#allocation3 + $0x10] sm:$0xff] %vm567_vm2, %v794_v1 }
  0xfd   : > { %v2118_v3 = vpop.f32.mrf.mxu0  ;;  %v864_v4 = vpop.f32.mrf.mxu1 }
  0xfe   : > { %871 = vst.msk [vmem:[#allocation3 + $0x18] sm:$0xff] %vm567_vm2, %v864_v4 }
  0xff   : > { %v2129_v5 = vpop.f32.mrf.mxu1 }
 0x103   : > { %v1179_v43 = vld [vmem:[#allocation3 + $0x10] sm:$0xff] }
 0x105   : > { %v1180_v46 = vld [vmem:[#allocation3 + $0x18] sm:$0xff] }
 0x106   : > { %v959_v6 = vpop.f32.mrf.mxu0  ;;  %v1029_v7 = vpop.f32.mrf.mxu1 }
 0x107   : > { %2177 = vmatmul.mubr.msk.f32.vlgmr.msra.gmra.mxu0 %vm567_vm2, %v959_v6  ;;  %2182 = vmatmul.mubr.msk.f32.vlgmr.msra.gmra.mxu1 %vm567_vm2, %v1029_v7 }
 0x108   : > { %2185 = vmatpush3.xpose.msk.msra.mxu0 %vm567_vm2, %v1175_v8  ;;  %2190 = vmatpush3.xpose.msk.msra.mxu1 %vm567_vm2, %v1176_v9  ;;  %v2140_v10 = vpop.f32.mrf.mxu0  ;;  %v2151_v11 = vpop.f32.mrf.mxu1 }
 0x109   : > { %2186 = vmatprep.mubr.msk.f32.mxu0 %vm2368_vm1, %v2367_v2  ;;  %2191 = vmatprep.mubr.msk.f32.mxu1 %vm2368_vm1, %v2367_v2 }
 0x10a   : > { %2194 = vmatprep.subr.mxu0 %v2367_v2  ;;  %2199 = vmatprep.subr.mxu1 %v2367_v2 }
 0x110   : > { %v1099_v12 = vpop.f32.mrf.mxu0  ;;  %v1169_v13 = vpop.f32.mrf.mxu1 }
 0x111   : > { %2187 = vmatmul.mubr.msk.f32.vlgmr.msra.gmra.mxu0 %vm567_vm2, %v1099_v12  ;;  %2192 = vmatmul.mubr.msk.f32.vlgmr.msra.gmra.mxu1 %vm567_vm2, %v1169_v13 }
 0x112   : > { %2195 = vmatpush3.msra.mxu0 %v1177_v14  ;;  %2200 = vmatpush3.msra.mxu1 %v1178_v15  ;;  %v2162_v16 = vpop.f32.mrf.mxu0  ;;  %v2173_v17 = vpop.f32.mrf.mxu1 }
 0x113   : > { %2196 = vmatprep.mubr.msk.f32.mxu0 %vm2368_vm1, %v2367_v2  ;;  %2204 = vmatprep.subr.mxu0 %v2367_v2 }
 0x114   : > { %2201 = vmatprep.mubr.msk.f32.mxu1 %vm2368_vm1, %v2367_v2  ;;  %2209 = vmatprep.subr.mxu1 %v2367_v2 }
 0x1c7   : > { %v1254_v18 = vpop.f32.mrf.mxu0  ;;  %v1330_v19 = vpop.f32.mrf.mxu1 }
 0x1c8   : > { %v1486_v20 = vsel %vm567_vm2, %v1254_v18, -inf  ;;  %v1489_v23 = vsel %vm567_vm2, %v1330_v19, -inf }
 0x1c9   : > { %1487 = vmax.xlane.f32.xlu0 %v1486_v20  ;;  %v2178_v21 = vpop.f32.mrf.mxu0  ;;  %v2183_v22 = vpop.f32.mrf.mxu1 }
 0x1cd   : > { %1490 = vmax.xlane.f32.xlu0 %v1489_v23 }
 0x1d1   : > { %v1406_v24 = vpop.f32.mrf.mxu0  ;;  %v1482_v25 = vpop.f32.mrf.mxu1 }
 0x1d2   : > { %v1492_v26 = vsel %vm567_vm2, %v1406_v24, -inf  ;;  %v1495_v29 = vsel %vm567_vm2, %v1482_v25, -inf }
 0x1d3   : > { %1493 = vmax.xlane.f32.xlu1 %v1492_v26  ;;  %v2188_v27 = vpop.f32.mrf.mxu0  ;;  %v2193_v28 = vpop.f32.mrf.mxu1 }
 0x1d7   : > { %1496 = vmax.xlane.f32.xlu1 %v1495_v29 }
 0x252   : > { %v1488_v30 = vpop.xlane.xlu0 %1487 }
 0x253   : > { %v1498_v31 = vsub.f32 %v1254_v18, %v1488_v30 }
 0x255   : > { %v1502_v32 = vmul.f32 1.442695, %v1498_v31 }
 0x256   : > { %v1491_v33 = vpop.xlane.xlu0 %1490 }
 0x257   : > { %2273 = vpow2.f32 %v1502_v32  ;;  %v1499_v34 = vsub.f32 %v1330_v19, %v1491_v33 }
 0x259   : > { %v1504_v35 = vmul.f32 1.442695, %v1499_v34 }
 0x25b   : > { %2275 = vpow2.f32 %v1504_v35 }
 0x25c   : > { %v1494_v36 = vpop.xlane.xlu1 %1493 }
 0x25d   : > { %v1500_v37 = vsub.f32 %v1406_v24, %v1494_v36 }
 0x25f   : > { %v1506_v38 = vmul.f32 1.442695, %v1500_v37 }
 0x260   : > { %v1497_v39 = vpop.xlane.xlu1 %1496 }
 0x261   : > { %2277 = vpow2.f32 %v1506_v38  ;;  %v1501_v40 = vsub.f32 %v1482_v25, %v1497_v39 }
 0x263   : > { %v1508_v41 = vmul.f32 1.442695, %v1501_v40 }
 0x264   : > { %v2274_v42 = vpop.eup %2273 }
 0x265   : > { %2279 = vpow2.f32 %v1508_v41  ;;  %2197 = vmatmul.mubr.msk.f32.vlgmr.msra.gmra.mxu0 %vm567_vm2, %v2274_v42  ;;  %v1510_v44 = vsel %vm567_vm2, %v2274_v42, 0.0 }
 0x266   : > { %2205 = vmatpush3.msra.mxu0 %v1179_v43  ;;  %1511 = vadd.xlane.f32.xlu0 %v1510_v44 }
 0x267   : > { %2206 = vmatprep.mubr.msk.f32.mxu0 %vm2368_vm1, %v2367_v2 }
 0x268   : > { %v2276_v45 = vpop.eup %2275 }
 0x269   : > { %2202 = vmatmul.mubr.msk.f32.vlgmr.msra.gmra.mxu1 %vm567_vm2, %v2276_v45  ;;  %v1513_v47 = vsel %vm567_vm2, %v2276_v45, 0.0 }
 0x26a   : > { %2210 = vmatpush3.msra.mxu1 %v1180_v46  ;;  %1514 = vadd.xlane.f32.xlu1 %v1513_v47 }
 0x26b   : > { %2211 = vmatprep.mubr.msk.f32.mxu1 %vm2368_vm1, %v2367_v2 }
 0x26e   : > { %v2278_v48 = vpop.eup %2277 }
 0x26f   : > { %2207 = vmatmul.mubr.msk.f32.vlgmr.msra.gmra.mxu0 %vm567_vm2, %v2278_v48  ;;  %v1516_v49 = vsel %vm567_vm2, %v2278_v48, 0.0 }
 0x270   : > { %1517 = vadd.xlane.f32.xlu0 %v1516_v49 }
 0x272   : > { %v2280_v50 = vpop.eup %2279 }
 0x273   : > { %2212 = vmatmul.mubr.msk.f32.vlgmr.msra.gmra.mxu1 %vm567_vm2, %v2280_v50  ;;  %v1519_v51 = vsel %vm567_vm2, %v2280_v50, 0.0 }
 0x274   : > { %1520 = vadd.xlane.f32.xlu1 %v1519_v51 }
 0x2ef   : > { %v1512_v52 = vpop.xlane.xlu0 %1511 }
 0x2f0   : > { %2281 = vrcp.f32 %v1512_v52 }
 0x2f3   : > { %v1515_v53 = vpop.xlane.xlu1 %1514 }
 0x2f4   : > { %2283 = vrcp.f32 %v1515_v53 }
 0x2f9   : > { %v1518_v54 = vpop.xlane.xlu0 %1517 }
 0x2fa   : > { %2285 = vrcp.f32 %v1518_v54 }
 0x2fd   : > { %v1521_v2 = vpop.xlane.xlu1 %1520  ;;  %v2282_v55 = vpop.eup %2281 }
 0x2fe   : > { %2287 = vrcp.f32 %v1521_v2 }
 0x301   : > { %v2284_v59 = vpop.eup %2283 }
 0x307   : > { %v2286_v63 = vpop.eup %2285 }
 0x30b   : > { %v2288_v4 = vpop.eup %2287 }
 0x325   : > { %v1591_v56 = vpop.f32.mrf.mxu0 }
 0x326   : > { %v1818_v57 = vmul.f32 %v2282_v55, %v1591_v56 }
 0x327   : > { %v2198_v58 = vpop.f32.mrf.mxu0 }
 0x328   : > { %1822 = vst.msk [vmem:[%s250_s17] sm:$0xff] %vm567_vm2, %v1818_v57 }
 0x329   : > { %v1664_v60 = vpop.f32.mrf.mxu1 }
 0x32a   : > { %v1819_v61 = vmul.f32 %v2284_v59, %v1664_v60 }
 0x32b   : > { %v2203_v62 = vpop.f32.mrf.mxu1 }
 0x32c   : > { %1823 = vst.msk [vmem:[%s250_s17 + $0x8] sm:$0xff] %vm567_vm2, %v1819_v61 }
 0x32f   : > { %v1737_v0 = vpop.f32.mrf.mxu0 }
 0x330   : > { %v1820_v1 = vmul.f32 %v2286_v63, %v1737_v0 }
 0x331   : > { %v2208_v3 = vpop.f32.mrf.mxu0 }
 0x332   : > { %1824 = vst.msk [vmem:[%s250_s17 + $0x10] sm:$0xff] %vm567_vm2, %v1820_v1 }
 0x333   : > { %v1810_v5 = vpop.f32.mrf.mxu1 }
 0x334   : > { %v1821_v6 = vmul.f32 %v2288_v4, %v1810_v5 }
 0x335   : > { %v2213_v7 = vpop.f32.mrf.mxu1 }
 0x336   : > { %1825 = vst.msk [vmem:[%s250_s17 + $0x18] sm:$0xff] %vm567_vm2, %v1821_v6 }
 0x337   : > { %2302 = shalt.err (!%p2299_p5)
}
 0x338   : > { %s2303_s13 = scalar_lea.hbm %s2774_s8, 512  ;;  %s2307_s27 = scalar_lea.hbm %s2829_s5, 1024 }
 0x339   : > { %p2304_p6 = scmp.ne.s32.totalorder %s2774_s8, %s2303_s13  ;;  %p2308_p10 = scmp.lt.s32.totalorder %s2774_s8, %s2829_s5 }
 0x33a   : > { %p2309_p11 = scmp.lt.s32.totalorder %s2307_s27, %s2303_s13 }
 0x33b   : > { %p2305_p7 = pnand %p2304_p6, %p2442_p4 }
 0x33c   : > { %p2310_p12 = por %p2309_p11, %p2308_p10 }
 0x33d   : > { %p2306_p9 = pneg %p2305_p7 }
 0x33f   : > { %p2311_p13 = pnand %p2310_p12, %p2306_p9 }
 0x341   : > { %2314 = shalt.err (!%p2311_p13)
}
 0x342   : > { %s2370_s25 = smov 128   ;;  %s2371_s29 = smov 8  }
 0x343   : > { %2214 = dma.vmem_to_hbm [thread:$0]  (%p2442_p4), %s2769_s24, 512, %s2774_s8, %s2779_s21, %s2370_s25, %s2370_s25, %s2371_s29  }
 0x344 PF: > { %p2220_p0 = scmp.ge.s32.totalorder %s2365_s23, 2  ;;  %s1856_s7 = sand.u32 1, %s2345_s18  }
 0x345   : > { %s1857_s9 = scalar_lea.sflag [#allocation5], %s1856_s7 }
 0x346   : > { %p2217_p1 = pnand %p2220_p0, %p2449_p8 }
 0x348   : > { %p2218_p2 = pneg %p2217_p1 }
 0x34a   : > { %2340 = dma.done.wait (%p2218_p2), %s1857_s9, 512  }
 0x34b   : > { %2342 = vsyncadd (%p2218_p2), %s1857_s9, 4294966784  ;;  %s18_s23 = sadd.s32 1, %s2365_s23   ;;  %s2832_s18 = smov %s2349_s19 }
 0x34c   : > { %p15_p3 = scmp.ge.s32.totalorder %s18_s23, 4   ;;  %s2833_s19 = smov %s2353_s20 }
 0x34d   : > { %s2834_s20 = smov %s2455_s6  ;;  %s2835_s21 = smov %s2361_s22 }
 0x34e   : > { %s2836_s22 = smov %s2838_s26  ;;  %17 = sbr.rel (!%p15_p3) target bundleno = 4 (0x4), region = 82 }
 0x353   :  { %1862 = vsyncpa [#allocation5], 1 }
 0x354   :  { %1864 = vsyncpa [#allocation5 + $0x1], 1 }

</bundles_post_ra>
